<compile_context>
chip_gen: v6e
topology: v6e:2x2x1
jax: 0.10.0
libtpu: 0.0.40
codegen_flags: <defaults>
</compile_context>

<pallas_src>
import math

import jax
import jax.numpy as jnp
from jax import lax
from jax.experimental import pallas as pl
from jax.experimental.pallas import tpu as pltpu


# ------------------------------ tiling helper --------------------------------

def _pick_tile(dim, pref, align):
    """Largest tile <= pref that is a multiple of `align` and divides `dim`.

    Falls back to the full dimension (block == full array dim is always legal)."""
    if dim <= pref:
        return dim
    t = (pref // align) * align
    while t >= align:
        if dim % t == 0:
            return t
        t -= align
    return dim


# --------------------------- linear: x @ W + b --------------------------------

def _linear_kernel(x_ref, w_ref, b_ref, o_ref, acc_ref):
    k = pl.program_id(2)

    @pl.when(k == 0)
    def _():
        acc_ref[...] = jnp.zeros_like(acc_ref)

    acc_ref[...] += jnp.dot(x_ref[...], w_ref[...],
                            preferred_element_type=jnp.float32)

    @pl.when(k == pl.num_programs(2) - 1)
    def _():
        o_ref[...] = (acc_ref[...] + b_ref[...].astype(jnp.float32)).astype(o_ref.dtype)


def pallas_linear(x, w, b, *, tm=256, tn=256, tk=512, out_dtype=None):
    """x: (M, K), w: (K, N), b: (N,) -> (M, N), tiled + K-accumulated in VMEM."""
    M, K = x.shape
    K2, N = w.shape
    assert K == K2, (x.shape, w.shape)
    out_dtype = out_dtype or x.dtype

    tm = _pick_tile(M, tm, 8)
    tn = _pick_tile(N, tn, 128)
    tk = _pick_tile(K, tk, 128)
    grid = (M // tm, N // tn, K // tk)

    b2 = b.reshape(1, N)

    return pl.pallas_call(
        _linear_kernel,
        out_shape=jax.ShapeDtypeStruct((M, N), out_dtype),
        grid_spec=pltpu.PrefetchScalarGridSpec(
            num_scalar_prefetch=0,
            grid=grid,
            in_specs=[
                pl.BlockSpec((tm, tk), lambda i, j, k: (i, k)),
                pl.BlockSpec((tk, tn), lambda i, j, k: (k, j)),
                pl.BlockSpec((1, tn), lambda i, j, k: (0, j)),
            ],
            out_specs=pl.BlockSpec((tm, tn), lambda i, j, k: (i, j)),
            scratch_shapes=[pltpu.VMEM((tm, tn), jnp.float32)],
        ),
        compiler_params=pltpu.CompilerParams(
            dimension_semantics=("parallel", "parallel", "arbitrary"),
            vmem_limit_bytes=32 * 1024 * 1024,
        ),
    )(x, w, b2)


# -------------------- attention in packed (B, L, H*d) layout ------------------

def _make_attn_kernel(num_heads, d_head):
    inv_scale = 1.0 / math.sqrt(d_head)

    def attn_kernel(bias_ref, q_ref, k_ref, v_ref, o_ref):
        # bias_ref: (1, 1, L) additive key-axis mask (0 keep / -10000 masked)
        # q/k/v_ref: (1, L, H*d) packed slabs; o_ref: (1, L, H*d)
        bias = bias_ref[0]                         # (1, L) -> broadcasts over query rows
        ctxs = []
        # Static unroll over heads: all head slices are compile-time lane offsets.
        for h in range(num_heads):
            lo, hi = h * d_head, (h + 1) * d_head
            q = q_ref[0, :, lo:hi]                 # (L, d)
            k = k_ref[0, :, lo:hi]                 # (L, d)
            v = v_ref[0, :, lo:hi]                 # (L, d)
            # score = q @ k^T / sqrt(d) + bias   (contract last dims, no transpose)
            score = lax.dot_general(
                q, k, (((1,), (1,)), ((), ())),
                preferred_element_type=jnp.float32) * inv_scale
            score = score + bias
            # softmax(dim=-1)
            score = score - jnp.max(score, axis=-1, keepdims=True)
            p = jnp.exp(score)
            inv_l = pl.reciprocal(jnp.sum(p, axis=-1, keepdims=True), approx=True)
            p = (p * inv_l).astype(v.dtype)
            ctxs.append(jnp.dot(p, v, preferred_element_type=jnp.float32))
        # One lane-dense (L, H*d) store per batch.
        o_ref[0, :, :] = jnp.concatenate(ctxs, axis=-1).astype(o_ref.dtype)

    return attn_kernel


def pallas_attention_packed(qkv, mask_bias, num_heads, d_head):
    """qkv: (B, L, 3*H*d) fused projections; mask_bias: (B, L) additive bias.

    Returns the attention context in packed (B, L, H*d) layout (ffw-ready)."""
    B, L, three_hd = qkv.shape
    hd = num_heads * d_head
    assert three_hd == 3 * hd

    bias3 = mask_bias.reshape(B, 1, L).astype(jnp.float32)
    kernel = _make_attn_kernel(num_heads, d_head)

    # TODO(synk): for long sequences add a KV-block grid axis with online-softmax
    # scratch (flash-attention pattern) instead of materializing the full (L, L) score.
    return pl.pallas_call(
        kernel,
        out_shape=jax.ShapeDtypeStruct((B, L, hd), qkv.dtype),
        grid_spec=pltpu.PrefetchScalarGridSpec(
            num_scalar_prefetch=0,
            grid=(B,),
            in_specs=[
                pl.BlockSpec((1, 1, L), lambda b: (b, 0, 0)),    # mask bias
                pl.BlockSpec((1, L, hd), lambda b: (b, 0, 0)),   # Q slab
                pl.BlockSpec((1, L, hd), lambda b: (b, 0, 1)),   # K slab
                pl.BlockSpec((1, L, hd), lambda b: (b, 0, 2)),   # V slab
            ],
            out_specs=pl.BlockSpec((1, L, hd), lambda b: (b, 0, 0)),
        ),
        compiler_params=pltpu.CompilerParams(
            dimension_semantics=("parallel",),
        ),
    )(bias3, qkv, qkv, qkv)


# --------------------------- module wrapper (glue) ----------------------------

def multi_head_self_attention(params, Q, attention_masks, K=None, V=None):
    """Equivalent of MultiHeadSelfAttention.forward(Q, attention_masks, K, V).

    Q:               (B, L, d_model) float32
    attention_masks: (B, L)          (1 = keep, 0 = masked, key axis)
    returns:         (B, L, d_model) float32
    """
    B, L, d_model = Q.shape
    H = params["num_heads"]
    d_k = d_model                        # per the module: d_k = d_v = d_model
    hd = H * d_k

    # Additive mask bias: 0 where kept, -10000 where masked (same softmax result
    # as masked_fill(-10000), one add instead of compare+select per element).
    mask_bias = (attention_masks.astype(jnp.float32) - 1.0) * 10000.0   # (B, L)

    if K is None and V is None:
        # Self-attention fast path: one fused QKV projection.
        W_qkv = jnp.concatenate([params["W_Q"], params["W_K"], params["W_V"]], axis=1)
        b_qkv = jnp.concatenate([params["b_Q"], params["b_K"], params["b_V"]], axis=0)
        qkv = pallas_linear(Q.reshape(B * L, d_model), W_qkv, b_qkv)     # (B*L, 3*H*d)
    else:
        if K is None:
            K = Q
        if V is None:
            V = Q
        q_p = pallas_linear(Q.reshape(B * L, d_model), params["W_Q"], params["b_Q"])
        k_p = pallas_linear(K.reshape(B * L, d_model), params["W_K"], params["b_K"])
        v_p = pallas_linear(V.reshape(B * L, d_model), params["W_V"], params["b_V"])
        qkv = jnp.concatenate([q_p, k_p, v_p], axis=-1)

    qkv3 = qkv.reshape(B, L, 3 * hd)

    # Attention in packed layout; context comes back as (B, L, H*d) — no transposes.
    context = pallas_attention_packed(qkv3, mask_bias, H, d_k)

    out = pallas_linear(context.reshape(B * L, hd), params["W_F"], params["b_F"])
    return out.reshape(B, L, d_model)


# ------------------------- pure-JAX reference check ---------------------------

def reference_forward(params, Q, attention_masks):
    B, L, d_model = Q.shape
    H = params["num_heads"]
    d_k = d_model
    x2d = Q.reshape(B * L, d_model)
    q = (x2d @ params["W_Q"] + params["b_Q"]).reshape(B, L, H, d_k).transpose(0, 2, 1, 3)
    k = (x2d @ params["W_K"] + params["b_K"]).reshape(B, L, H, d_k).transpose(0, 2, 1, 3)
    v = (x2d @ params["W_V"] + params["b_V"]).reshape(B, L, H, d_k).transpose(0, 2, 1, 3)
    score = jnp.einsum("bhqd,bhkd->bhqk", q, k) / math.sqrt(d_k)
    mask = attention_masks.reshape(B, 1, 1, L)
    score = jnp.where(mask == 0, -10000.0, score)
    score = jax.nn.softmax(score, axis=-1)
    ctx = jnp.einsum("bhqk,bhkd->bhqd", score, v)
    ctx = ctx.transpose(0, 2, 1, 3).reshape(B * L, H * d_k)
    return (ctx @ params["W_F"] + params["b_F"]).reshape(B, L, d_model)


# ----------------------------------- main --------------------------------------

if __name__ == "__main__":
    # Small shapes consistent with the module
    B, L, d_model, H = 2, 8, 32, 4
    dropout = 0.1  # unused in forward (no-op)

    key = jax.random.PRNGKey(0)
    keys = jax.random.split(key, 10)

    def init_w(k, shape, fan_in):
        bound = 1.0 / math.sqrt(fan_in)
        return jax.random.uniform(k, shape, jnp.float32, -bound, bound)

    params = {
        "num_heads": H,
        # nn.Linear(d_model, d_model * H): weights stored here as (in, out)
        "W_Q": init_w(keys[0], (d_model, d_model * H), d_model),
        "b_Q": init_w(keys[1], (d_model * H,), d_model),
        "W_K": init_w(keys[2], (d_model, d_model * H), d_model),
        "b_K": init_w(keys[3], (d_model * H,), d_model),
        "W_V": init_w(keys[4], (d_model, d_model * H), d_model),
        "b_V": init_w(keys[5], (d_model * H,), d_model),
        # ffw: nn.Linear(d_model * H, d_model)
        "W_F": init_w(keys[6], (d_model * H, d_model), d_model * H),
        "b_F": init_w(keys[7], (d_model,), d_model * H),
    }

    Q = jax.random.normal(keys[8], (B, L, d_model), jnp.float32)
    # mask: 1 = keep, 0 = masked; mask out the last two key positions of batch 1
    attention_masks = jnp.ones((B, L), jnp.float32).at[1, L - 2:].set(0.0)

    out = multi_head_self_attention(params, Q, attention_masks)
    out = jax.block_until_ready(out)

    ref = reference_forward(params, Q, attention_masks)
    assert out.shape == (B, L, d_model)
    # Slightly relaxed tolerance: softmax normalization uses the EUP approximate
    # reciprocal (pl.reciprocal(approx=True)); all accumulation remains f32.
    assert jnp.allclose(out, ref, atol=5e-3, rtol=5e-3), "Pallas output mismatch vs JAX reference"

    print("KERNEL_OK")
</pallas_src>

<mosaic_0001>
module attributes {stable_mosaic.version = 11 : i64} {
  func.func @_linear_kernel(%arg0: i32, %arg1: i32, %arg2: i32, %arg3: memref<16x32xf32, #tpu.memory_space<vmem>>, %arg4: memref<32x128xf32, #tpu.memory_space<vmem>>, %arg5: memref<1x128xf32, #tpu.memory_space<vmem>>, %arg6: memref<16x128xf32, #tpu.memory_space<vmem>>, %arg7: memref<16x128xf32, #tpu.memory_space<vmem>>) attributes {dimension_semantics = [#tpu.dimension_semantics<parallel>, #tpu.dimension_semantics<parallel>, #tpu.dimension_semantics<arbitrary>], iteration_bounds = array<i64: 1, 3, 1>, scalar_prefetch = 0 : i64, scratch_operands = 1 : i64, tpu.core_type = #tpu.core_type<tc>, window_params = [{transform_indices = @transform_0, window_bounds = array<i64: 16, 32>}, {transform_indices = @transform_1, window_bounds = array<i64: 32, 128>}, {transform_indices = @transform_2, window_bounds = array<i64: 1, 128>}, {transform_indices = @transform_3, window_bounds = array<i64: 16, 128>}]} {
    %c0_i32 = arith.constant 0 : i32
    %0 = arith.cmpi eq, %arg2, %c0_i32 : i32
    %1 = arith.extui %0 : i1 to i32
    %c0_i32_0 = arith.constant 0 : i32
    %2 = arith.cmpi ne, %1, %c0_i32_0 : i32
    scf.if %2 {
      %cst_10 = arith.constant 0.000000e+00 : f32
      %12 = vector.broadcast %cst_10 : f32 to vector<16x128xf32>
      %c0_11 = arith.constant 0 : index
      %c0_12 = arith.constant 0 : index
      %13 = vector.load %arg7[%c0_11, %c0_12] : memref<16x128xf32, #tpu.memory_space<vmem>>, vector<16x128xf32>
      tpu.vector_store %arg7[%c0_11, %c0_12], %12 {strides = array<i32>} : memref<16x128xf32, #tpu.memory_space<vmem>>, vector<16x128xf32>,
    } else {
    }
    %c0 = arith.constant 0 : index
    %c0_1 = arith.constant 0 : index
    %3 = vector.load %arg7[%c0, %c0_1] : memref<16x128xf32, #tpu.memory_space<vmem>>, vector<16x128xf32>
    %c0_2 = arith.constant 0 : index
    %c0_3 = arith.constant 0 : index
    %4 = vector.load %arg3[%c0_2, %c0_3] : memref<16x32xf32, #tpu.memory_space<vmem>>, vector<16x32xf32>
    %c0_4 = arith.constant 0 : index
    %c0_5 = arith.constant 0 : index
    %5 = vector.load %arg4[%c0_4, %c0_5] : memref<32x128xf32, #tpu.memory_space<vmem>>, vector<32x128xf32>
    %cst = arith.constant dense<0.000000e+00> : vector<16x128xf32>
    %6 = tpu.matmul %4, %5, %cst {dimension_numbers = #tpu.dot_dimension_numbers<[1], [0], [0], [1], [0, 0, 1, 1], [], []>} : vector<16x32xf32>, vector<32x128xf32>, vector<16x128xf32> -> vector<16x128xf32>
    %7 = arith.addf %3, %6 : vector<16x128xf32>
    %c0_6 = arith.constant 0 : index
    %c0_7 = arith.constant 0 : index
    %8 = vector.load %arg7[%c0_6, %c0_7] : memref<16x128xf32, #tpu.memory_space<vmem>>, vector<16x128xf32>
    tpu.vector_store %arg7[%c0_6, %c0_7], %7 {strides = array<i32>} : memref<16x128xf32, #tpu.memory_space<vmem>>, vector<16x128xf32>,
    %c0_i32_8 = arith.constant 0 : i32
    %9 = arith.cmpi eq, %arg2, %c0_i32_8 : i32
    %10 = arith.extui %9 : i1 to i32
    %c0_i32_9 = arith.constant 0 : i32
    %11 = arith.cmpi ne, %10, %c0_i32_9 : i32
    scf.if %11 {
      %c0_10 = arith.constant 0 : index
      %c0_11 = arith.constant 0 : index
      %12 = vector.load %arg7[%c0_10, %c0_11] : memref<16x128xf32, #tpu.memory_space<vmem>>, vector<16x128xf32>
      %c0_12 = arith.constant 0 : index
      %c0_13 = arith.constant 0 : index
      %13 = vector.load %arg5[%c0_12, %c0_13] : memref<1x128xf32, #tpu.memory_space<vmem>>, vector<1x128xf32>
      %14 = vector.broadcast %13 : vector<1x128xf32> to vector<16x128xf32>
      %15 = arith.addf %12, %14 : vector<16x128xf32>
      %c0_14 = arith.constant 0 : index
      %c0_15 = arith.constant 0 : index
      %16 = vector.load %arg6[%c0_14, %c0_15] : memref<16x128xf32, #tpu.memory_space<vmem>>, vector<16x128xf32>
      tpu.vector_store %arg6[%c0_14, %c0_15], %15 {strides = array<i32>} : memref<16x128xf32, #tpu.memory_space<vmem>>, vector<16x128xf32>,
    } else {
    }
    return
  }
  func.func @transform_0(%arg0: i32, %arg1: i32, %arg2: i32) -> (i32, i32) {
    %c0_i32 = arith.constant 0 : i32
    return %arg0, %arg2 : i32, i32
  }
  func.func @transform_1(%arg0: i32, %arg1: i32, %arg2: i32) -> (i32, i32) {
    %c0_i32 = arith.constant 0 : i32
    return %arg2, %arg1 : i32, i32
  }
  func.func @transform_2(%arg0: i32, %arg1: i32, %arg2: i32) -> (i32, i32) {
    %c0_i32 = arith.constant 0 : i32
    %c0_i32_0 = arith.constant 0 : i32
    return %c0_i32, %arg1 : i32, i32
  }
  func.func @transform_3(%arg0: i32, %arg1: i32, %arg2: i32) -> (i32, i32) {
    %c0_i32 = arith.constant 0 : i32
    return %arg0, %arg1 : i32, i32
  }
}

</mosaic_0001>

<bundles_post_ra>
// kernel: tpu_custom_call.1
= control target key start
LH: loop header
LB: loop body
LE: loop exit
PB: predicated region body
PF: predicated region fallthrough
CT: control target
= control target key end

     0   :  { %8 = vsyncpa [#allocation4], 0  ;;  %s971_s0 = inlined_call_operand.hbm [shape: f32[16,32], index: 0, kind: input, shape index: {}]   ;;  %s972_s1 = inlined_call_operand.hbm [shape: f32[32,384], index: 1, kind: input, shape index: {}]   ;;  %s973_s2 = inlined_call_operand.vmem [shape: f32[1,384], index: 2, kind: input, shape index: {}]   ;;  %s974_s3 = inlined_call_operand.hbm [shape: f32[16,384], index: 3, kind: output, shape index: {}]  }
   0x1   :  { %9 = vsyncpa [#allocation7], 0 }
   0x2   :  { %11 = vsyncpa [#allocation7 + $0x1], 0 }
   0x3   :  { %12 = vsyncpa [#allocation5], 0 }
   0x4   :  { %14 = vsyncpa [#allocation5 + $0x1], 0  ;;  %s785_s12 = smov 0   ;;  %s787_s13 = smov 0  }
   0x5   :  { %s789_s14 = smov 0   ;;  %s791_s15 = smov 0  }
   0x6   :  { %s793_s16 = smov 0   ;;  %s795_s17 = smov 0  }
   0x7 LB: > { %980 = sst [smem:[#allocation12_spill]] %s734_s12  ;;  %s502_s18 = sadd.s32 4294967295, %s754_s17   ;;  %s754_s17 = sphi %s795_s17, %s20_s17   ;;  %s750_s16 = sphi %s793_s16, %s1001_s16   ;;  %s746_s15 = sphi %s791_s15, %s1000_s15   ;;  %s742_s14 = sphi %s789_s14, %s999_s14   ;;  %s738_s13 = sphi %s787_s13, %s998_s13   ;;  %s734_s12 = sphi %s785_s12, %s997_s12  }
   0x8   : > { %s503_s19 = sadd.s32 4294967294, %s754_s17   ;;  %p83_p0 = scmp.ne.s32.totalorder %s742_s14, %s738_s13 }
   0x9   : > { %p84_p1 = scmp.eq.s32.totalorder %s754_s17, 0  ;;  %p89_p2 = scmp.ne.s32.totalorder %s738_s13, %s734_s12 }
   0xa   : > { %p822_p3 = scmp.eq.s32.totalorder %s502_s18, 0  ;;  %p141_p5 = scmp.eq.s32.totalorder %s502_s18, 2 }
   0xb   : > { %p826_p4 = por %p84_p1, %p83_p0  ;;  %p147_p7 = scmp.eq.s32.totalorder %s503_s19, 2 }
   0xc   : > { %p832_p6 = por %p822_p3, %p89_p2  ;;  %p836_p8 = por %p141_p5, %p83_p0 }
   0xd   : > { %p504_p9 = scmp.ge.s32.totalorder %s754_s17, 1  ;;  %p841_p10 = por %p147_p7, %p89_p2 }
   0xe   : > { %s983_s22 = scalar_select %p832_p6, 1, 0 }
   0xf   : > { %s984_s23 = scalar_select %p836_p8, 1, 0 }
  0x10   : > { %s985_s24 = scalar_select %p841_p10, 1, 0 }
  0x11   : > { %p154_p11 = scmp.lt.s32.totalorder %s754_s17, 4  ;;  %s756_s26 = smov [#allocation3]  }
  0x12   : > { %986 = sst [smem:[#allocation13_spill]] %s985_s24  ;;  %s170_s27 = sshll.u32 %s756_s26, 4  ;;  %s171_s27 = int_to_ptr.vmem [resolvable:$true] %s170_s27 }
  0x13   : > { %p846_p12 = pnand %p504_p9, %p154_p11  ;;  %p558_p0 = scmp.lt.s32.totalorder %s754_s17, 3 }
  0x14   : > { %s35_s30 = sadd.s32 1, %s750_s16  ;;  %s627_s4 = scalar_lea.vmem %s171_s27, 256 }
  0x15   : > { %p545_p13 = pneg %p846_p12  ;;  %p861_p2 = pnand %p558_p0, %p826_p4 }
  0x16   : > { %p628_p7 = scmp.ne.s32.totalorder %s171_s27, %s627_s4  ;;  %p635_p10 = scmp.lt.s32.totalorder %s171_s27, %s171_s27 }
  0x17   : > { %p855_p1 = pnand %p545_p13, %p822_p3  ;;  %p636_p8 = scmp.lt.s32.totalorder %s627_s4, %s627_s4 }
  0x19   : > { %p618_p5 = pneg %p855_p1  ;;  %p637_p6 = por %p636_p8, %p635_p10 }
  0x1b   : > { %p630_p9 = pnand %p628_p7, %p618_p5 }
  0x1d   : > { %p631_p11 = pneg %p630_p9 }
  0x1f   : > { %p638_p13 = pnand %p637_p6, %p631_p11 }
  0x21   : > { %641 = shalt.err (!%p638_p13)
}
  0x22   : > { %s979_s5 = smov 128   ;;  %s758_s6 = smov 8  }
  0x23   : > { %548 = dma.hbm_to_vmem [thread:$0]  (!%p855_p1), %s971_s0, 256, %s171_s27, [#allocation4], %s979_s5, %s979_s5, %s758_s6  }
  0x24   : > { %p37_p4 = scmp.ge.s32.totalorder %s35_s30, 3  ;;  %s76_s9 = sadd.s32 1, %s742_s14 }
  0x25   : > { %s184_s10 = sand.u32 1, %s742_s14   ;;  %s508_s19 = sshll.u32 %s750_s16, 7 }
  0x26   : > { %s1003_s30 = smov (%p37_p4, %s35_s30), 0  ;;  %s507_s11 = sshll.u32 %s184_s10, 5 }
  0x27   : > { %s72_s18 = ssub.s32 %s750_s16, %s1003_s30  ;;  %s196_s28 = scalar_lea.hbm %s972_s1, %s508_s19 }
  0x28   : > { %p74_p6 = scmp.eq.s32.totalorder %s72_s18, 0  ;;  %s188_s4 = scalar_lea.vmem [#allocation6], %s507_s11 }
  0x29   : > { %s197_s24 = sshll.u32 %s188_s4, 4  ;;  %s185_s27 = scalar_lea.sflag [#allocation7], %s184_s10  ;;  %s198_s24 = int_to_ptr.vmem [resolvable:$true] %s197_s24 }
  0x2a   : > { %s887_s12 = scalar_select %p74_p6, %s742_s14, %s76_s9  }
  0x2b   : > { %p644_p8 = pneg %p861_p2  ;;  %s655_s7 = scalar_lea.vmem %s198_s24, 512 }
  0x2c   : > { %p656_p10 = scmp.ne.s32.totalorder %s198_s24, %s655_s7  ;;  %s759_s8 = smov [#allocation6]  }
  0x2d   : > { %s660_s5 = sshll.u32 %s759_s8, 4  ;;  %s661_s5 = int_to_ptr.vmem [resolvable:$false] %s660_s5 }
  0x2e   : > { %p658_p0 = pnand %p656_p10, %p644_p8  ;;  %s662_s18 = scalar_lea.vmem %s661_s5, 1024 }
  0x2f   : > { %p663_p5 = scmp.lt.s32.totalorder %s198_s24, %s661_s5  ;;  %p664_p7 = scmp.lt.s32.totalorder %s662_s18, %s655_s7 }
  0x30   : > { %p659_p1 = pneg %p658_p0 }
  0x31   : > { %p665_p9 = por %p664_p7, %p663_p5 }
  0x33   : > { %p666_p11 = pnand %p665_p9, %p659_p1 }
  0x35   : > { %669 = shalt.err (!%p666_p11)
}
  0x36   : > { %s760_s11 = smov 384   ;;  %s990_s9 = smov 128  }
  0x37   : > { %552 = dma.hbm_to_vmem [thread:$0]  (!%p861_p2), %s196_s28, 512, %s198_s24, %s185_s27, %s760_s11, %s990_s9, %s758_s6  }
  0x38   : > { %215 = sbr.rel (%p846_p12) target bundleno = 287 (0x11f), region = 32 }
  0x3d   : > { %721 = dma.done.wait (%p822_p3), [#allocation4], 256  }
  0x3e   : > { %723 = vsyncadd (%p822_p3), [#allocation4], 4294967040  ;;  %s902_s5 = sand.u32 1, %s738_s13   ;;  %p991_p13 = scmp.ne.s32.totalorder %s983_s22, 0 }
  0x3f   : > { %s511_s10 = sshll.u32 %s902_s5, 5  ;;  %s222_s29 = scalar_lea.sflag [#allocation7], %s902_s5 }
  0x40   : > { %s225_s19 = scalar_lea.vmem [#allocation6], %s511_s10 }
  0x41   : > { %725 = dma.done.wait (%p991_p13), %s222_s29, 512  }
  0x42   : > { %727 = vsyncadd (%p991_p13), %s222_s29, 4294966784  ;;  %vm271_vm0 = vcmask 261120   ;;  %v270_v0 = vld [vmem:[%s225_s19 + $0x18] sm:$0xff]  ;;  %v269_v1 = vld [vmem:[%s225_s19 + $0x10] sm:$0xff]  ;;  %p253_p3 = scmp.lt.s32.totalorder %s746_s15, 2  ;;  %s512_s22 = sshll.u32 %s902_s5, 4 }
  0x43   : > { %526 = vmatprep.subr.mxu0 %v270_v0  ;;  %v265_v2 = vld [vmem:[#allocation3] sm:$0xff]  ;;  %v268_v3 = vld [vmem:[%s225_s19 + $0x8] sm:$0xff]  ;;  %v267_v4 = vld [vmem:[%s225_s19] sm:$0xff]  ;;  %s250_s21 = scalar_lea.vmem [#allocation8], %s512_s22  ;;  %s517_s28 = sshll.u32 %s746_s15, 7 }
  0x44   : > { %527 = vmatpush3.msra.mxu0 %v270_v0  ;;  %534 = vmatprep.mubr.msk.f32.mxu0 %vm271_vm0, %v265_v2  ;;  %v266_v5 = vld [vmem:[#allocation3 + $0x8] sm:$0xff]  ;;  %s254_s20 = scalar_select %p253_p3, %s746_s15, 2 }
  0x45   : > { %528 = vmatprep.subr.mxu0 %v269_v1  ;;  %s389_s26 = sshll.u32 %s250_s21, 4  ;;  %s924_s7 = scalar_lea.hbm %s974_s3, %s517_s28  ;;  %s919_s26 = int_to_ptr.vmem [resolvable:$true] %s389_s26 }
  0x46   : > { %529 = vmatpush3.msra.mxu0 %v269_v1  ;;  %s255_s6 = scalar_lea.vmem %s973_s2, %s254_s20  ;;  %s374_s8 = scalar_lea.sflag [#allocation5], %s902_s5 }
  0x47   : > { %530 = vmatprep.subr.mxu0 %v268_v3  ;;  %v515_v6 = vld [vmem:[%s255_s6] ss:$0 sm:$0xff]  ;;  %s670_s18 = scalar_lea.vmem %s919_s26, 256  ;;  %p992_p2 = scmp.ne.s32.totalorder %s984_s23, 0 }
  0x48   : > { %531 = vmatpush3.msra.mxu0 %v268_v3  ;;  %p671_p12 = scmp.ne.s32.totalorder %s919_s26, %s670_s18  ;;  %s761_s15 = smov [#allocation8]  }
  0x49   : > { %532 = vmatprep.subr.mxu0 %v267_v4  ;;  %s674_s11 = sshll.u32 %s761_s15, 4  ;;  %s675_s11 = int_to_ptr.vmem [resolvable:$false] %s674_s11 }
  0x4a   : > { %533 = vmatpush3.msra.mxu0 %v267_v4  ;;  %p672_p4 = pnand %p671_p12, %p992_p2  ;;  %s676_s9 = scalar_lea.vmem %s675_s11, 512 }
  0x4b   : > { %535 = vmatmul.mubr.msk.f32.vlgmr.msra.gmra.mxu0 %vm271_vm0, %v266_v5  ;;  %p677_p8 = scmp.lt.s32.totalorder %s919_s26, %s675_s11  ;;  %p678_p10 = scmp.lt.s32.totalorder %s676_s9, %s670_s18 }
  0x4c   : > { %p673_p6 = pneg %p672_p4 }
  0x4d   : > { %p679_p0 = por %p678_p10, %p677_p8 }
  0x4f   : > { %p680_p1 = pnand %p679_p0, %p673_p6 }
 0x10b   : > { %v536_v7 = vpop.f32.mrf.mxu0 }
 0x10c   : > { %v370_v8 = vadd.f32 %v536_v7, %v515_v6 }
 0x10d   : > { %v344_v9 = vpop.f32.mrf.mxu0 }
 0x10e   : > { %372 = vst [vmem:[%s250_s21 + $0x8] sm:$0xff] %v370_v8  ;;  %v369_v10 = vadd.f32 %v515_v6, %v344_v9 }
 0x110   : > { %371 = vst [vmem:[%s250_s21] sm:$0xff] %v369_v10 }
 0x111   : > { %683 = shalt.err (!%p680_p1)
}
 0x112   : > { %s684_s10 = scalar_lea.hbm %s924_s7, 256  ;;  %s688_s20 = scalar_lea.hbm %s974_s3, 768 }
 0x113   : > { %p685_p5 = scmp.ne.s32.totalorder %s924_s7, %s684_s10  ;;  %p689_p11 = scmp.lt.s32.totalorder %s924_s7, %s974_s3 }
 0x114   : > { %p690_p13 = scmp.lt.s32.totalorder %s688_s20, %s684_s10 }
 0x115   : > { %p686_p7 = pnand %p685_p5, %p992_p2 }
 0x116   : > { %p691_p3 = por %p690_p13, %p689_p11 }
 0x117   : > { %p687_p9 = pneg %p686_p7 }
 0x119   : > { %p692_p12 = pnand %p691_p3, %p687_p9 }
 0x11b   : > { %695 = shalt.err (!%p692_p12)
}
 0x11c   : > { %s762_s25 = smov 128   ;;  %s763_s6 = smov 384  }
 0x11d   : > { %s764_s21 = smov 8  }
 0x11e   : > { %543 = dma.vmem_to_hbm [thread:$0]  (%p992_p2), %s919_s26, 256, %s924_s7, %s374_s8, %s762_s25, %s763_s6, %s764_s21  }
 0x11f PF: > { %s993_s28 = sld [smem:[#allocation12_spill]]  ;;  %p560_p4 = scmp.ge.s32.totalorder %s754_s17, 2 }
 0x120   : > { %s994_s4 = sld [smem:[#allocation13_spill]] }
 0x125   : > { %s404_s27 = sand.u32 1, %s993_s28  }
 0x126   : > { %p995_p6 = scmp.ne.s32.totalorder %s994_s4, 0  ;;  %s405_s18 = scalar_lea.sflag [#allocation5], %s404_s27 }
 0x128   : > { %p554_p8 = pnand %p560_p4, %p995_p6 }
 0x12a   : > { %p555_p10 = pneg %p554_p8 }
 0x12c   : > { %729 = dma.done.wait (%p555_p10), %s405_s18, 256  }
 0x12d   : > { %731 = vsyncadd (%p555_p10), %s405_s18, 4294967040  ;;  %s20_s17 = sadd.s32 1, %s754_s17   ;;  %s996_s23 = smov %s887_s12 }
 0x12e   : > { %p17_p0 = scmp.ge.s32.totalorder %s20_s17, 5   ;;  %s997_s12 = smov %s738_s13 }
 0x12f   : > { %s998_s13 = smov %s742_s14  ;;  %s999_s14 = smov %s996_s23 }
 0x130   : > { %s1000_s15 = smov %s750_s16  ;;  %s1001_s16 = smov %s1003_s30 }
 0x131   :  { %19 = sbr.rel (!%p17_p0) target bundleno = 7 (0x7), region = 94 }
 0x136   :  { %410 = vsyncpa [#allocation4], 1 }
 0x137   :  { %412 = vsyncpa [#allocation4 + $0x1], 1 }
 0x138   :  { %413 = vsyncpa [#allocation7], 1 }
 0x139   :  { %415 = vsyncpa [#allocation7 + $0x1], 1 }
 0x13a   :  { %416 = vsyncpa [#allocation5], 1 }
 0x13b   :  { %418 = vsyncpa [#allocation5 + $0x1], 1 }

</bundles_post_ra>
